<compile_context>
chip_gen: v5e
topology: v5e:2x2
jax: 0.10.0
libtpu: 0.0.40
codegen_flags: <defaults>
</compile_context>

<pallas_src>
import functools

import jax
import jax.numpy as jnp
from jax.experimental import pallas as pl
from jax.experimental.pallas import tpu as pltpu


def _activation_fn(name):
    if name == "tanh":
        return jnp.tanh
    if name == "relu":
        return lambda v: jnp.maximum(v, 0.0)
    if name == "sigmoid":
        return jax.nn.sigmoid
    raise ValueError(f"unsupported activation: {name}")


def _mlp_value_kernel(x_ref, w1_ref, b1_ref, w2_ref, b2_ref, wv_ref, bv_ref,
                      out_ref, *, activation):
    act = _activation_fn(activation)

    # Hidden layer 1: bf16 operands on the MXU, f32 accumulate, f32 bias+act.
    x = x_ref[...]                                              # bf16 [bb, d_in]
    h = jnp.dot(x, w1_ref[...],
                preferred_element_type=jnp.float32) + b1_ref[...]
    h = act(h)                                                  # f32 [bb, h1]

    # Hidden layer 2.
    h = jnp.dot(h.astype(jnp.bfloat16), w2_ref[...],
                preferred_element_type=jnp.float32) + b2_ref[...]
    h = act(h)                                                  # f32 [bb, h2]

    # Value head (out_features = 1): an N=1 matmul lights up a single MXU
    # column, so do it on the VPU/XLU instead: elementwise multiply by the
    # (1, h2) weight row and reduce over lanes.
    v = jnp.sum(h * wv_ref[...], axis=-1, keepdims=True) + bv_ref[0]
    out_ref[...] = v.astype(out_ref.dtype)


@functools.partial(jax.jit, static_argnames=("block_b", "activation"))
def mlp_value_forward(x, params, *, block_b=None, activation="tanh"):
    """Fused Pallas forward of MLPValueFunction (rms=None)."""
    w1, b1, w2, b2, wv, bv = params
    B, d_in = x.shape
    h1 = w1.shape[1]
    h2 = w2.shape[1]

    # Batch-tile selection. bf16 x needs the tile rows to be a multiple of 16
    # unless the tile spans the whole (padded) batch.
    if block_b is None:
        if B > 256:
            block_b = 256               # big batches: 256-row MXU tiles
        elif B % 32 == 0:
            block_b = B // 2            # >=2 grid steps -> v7x can use both TCs
        else:
            block_b = B                 # small batch: single tile, grid=(1,)

    # Pad the batch so it divides evenly; padded rows are independent and are
    # sliced off afterwards.
    padded_b = pl.cdiv(B, block_b) * block_b
    xb = x.astype(jnp.bfloat16)
    if padded_b != B:
        xb = jnp.pad(xb, ((0, padded_b - B), (0, 0)))

    w1b = w1.astype(jnp.bfloat16)
    w2b = w2.astype(jnp.bfloat16)
    wv_row = wv.reshape(1, h2).astype(jnp.float32)   # value weights as a lane row
    bv_flat = bv.reshape(-1).astype(jnp.float32)     # (1,) scalar -> SMEM

    grid = (padded_b // block_b,)

    # Weights / biases are small: full arrays resident in VMEM for every tile.
    full = lambda shape: pl.BlockSpec(shape, lambda i: (0, 0))

    out = pl.pallas_call(
        functools.partial(_mlp_value_kernel, activation=activation),
        out_shape=jax.ShapeDtypeStruct((padded_b, 1), jnp.float32),
        grid_spec=pltpu.PrefetchScalarGridSpec(
            num_scalar_prefetch=0,
            grid=grid,
            in_specs=[
                pl.BlockSpec((block_b, d_in), lambda i: (i, 0)),   # x tile (bf16)
                full((d_in, h1)),                                  # W1 (bf16)
                full((1, h1)),                                     # b1 (f32)
                full((h1, h2)),                                    # W2 (bf16)
                full((1, h2)),                                     # b2 (f32)
                full((1, h2)),                                     # Wv row (f32)
                pl.BlockSpec(memory_space=pltpu.MemorySpace.SMEM), # bv scalar
            ],
            out_specs=pl.BlockSpec((block_b, 1), lambda i: (i, 0)),
        ),
        compiler_params=pltpu.CompilerParams(
            dimension_semantics=("parallel",)),
    )(xb, w1b, b1, w2b, b2, wv_row, bv_flat)
    return out[:B]


def init_mlp_value_params(key, input_dim, hidden_sizes=(128, 128)):
    """Init mirroring torch.nn.Linear default U[-1/sqrt(fan_in), 1/sqrt(fan_in)],
    plus the module's value.weight *= 0.1 and value.bias *= 0.0."""
    dims = (input_dim,) + tuple(hidden_sizes)
    params = []
    keys = jax.random.split(key, len(hidden_sizes) + 1)

    for li, (fan_in, fan_out) in enumerate(zip(dims[:-1], dims[1:])):
        kw, kb = jax.random.split(keys[li])
        bound = 1.0 / (fan_in ** 0.5)
        w = jax.random.uniform(kw, (fan_in, fan_out), jnp.float32, -bound, bound)
        b = jax.random.uniform(kb, (1, fan_out), jnp.float32, -bound, bound)
        params += [w, b]

    # value head: Linear(last_dim, 1), weight scaled by 0.1, bias zeroed.
    fan_in = dims[-1]
    kw, _ = jax.random.split(keys[-1])
    bound = 1.0 / (fan_in ** 0.5)
    wv = 0.1 * jax.random.uniform(kw, (fan_in, 1), jnp.float32, -bound, bound)
    bv = jnp.zeros((1, 1), jnp.float32)
    params += [wv, bv]
    return tuple(params)


def mlp_value_reference(x, params, activation="tanh"):
    """Pure-JAX f32 reference for correctness checking."""
    act = _activation_fn(activation)
    w1, b1, w2, b2, wv, bv = params
    h = act(x @ w1 + b1)
    h = act(h @ w2 + b2)
    return h @ wv + bv


if __name__ == "__main__":
    # Small shapes consistent with the module: batch=16, input_dim=16,
    # hidden_sizes=(128, 128) (module defaults), output dim 1.
    key = jax.random.PRNGKey(0)
    k_x, k_p = jax.random.split(key)

    B, input_dim = 16, 16
    hidden_sizes = (128, 128)

    x = jax.random.normal(k_x, (B, input_dim), jnp.float32)
    params = init_mlp_value_params(k_p, input_dim, hidden_sizes)

    # TODO(synk): the optional `rms.normalize(x)` pre-step has no fixed spec
    # here (rms=None in this synthetic setup), so it is omitted.

    value = mlp_value_forward(x, params)
    value = jax.block_until_ready(value)

    ref = mlp_value_reference(x, params)
    assert value.shape == (B, 1)
    max_err = jnp.max(jnp.abs(value - ref))
    # bf16 MXU operands + f32 accumulation -> relaxed tolerance vs f32 ref.
    assert jnp.allclose(value, ref, atol=3e-3, rtol=2e-2), f"max err {max_err}"

    print("KERNEL_OK")
</pallas_src>

<mosaic_0001>
module attributes {stable_mosaic.version = 11 : i64} {
  func.func @_mlp_value_kernel(%arg0: i32, %arg1: memref<16x16xbf16, #tpu.memory_space<vmem>>, %arg2: memref<16x128xbf16, #tpu.memory_space<vmem>>, %arg3: memref<1x128xf32, #tpu.memory_space<vmem>>, %arg4: memref<128x128xbf16, #tpu.memory_space<vmem>>, %arg5: memref<1x128xf32, #tpu.memory_space<vmem>>, %arg6: memref<1x128xf32, #tpu.memory_space<vmem>>, %arg7: memref<1xf32, #tpu.memory_space<smem>>, %arg8: memref<16x1xf32, #tpu.memory_space<vmem>>) attributes {dimension_semantics = [#tpu.dimension_semantics<parallel>], iteration_bounds = array<i64: 1>, scalar_prefetch = 0 : i64, scratch_operands = 0 : i64, tpu.core_type = #tpu.core_type<tc>, window_params = [{transform_indices = @transform_0, window_bounds = array<i64: 16, 16>}, {pipeline_mode = #tpu.pipeline_mode<synchronous>, transform_indices = @transform_1, window_bounds = array<i64: 16, 128>}, {pipeline_mode = #tpu.pipeline_mode<synchronous>, transform_indices = @transform_2, window_bounds = array<i64: 1, 128>}, {pipeline_mode = #tpu.pipeline_mode<synchronous>, transform_indices = @transform_3, window_bounds = array<i64: 128, 128>}, {pipeline_mode = #tpu.pipeline_mode<synchronous>, transform_indices = @transform_4, window_bounds = array<i64: 1, 128>}, {pipeline_mode = #tpu.pipeline_mode<synchronous>, transform_indices = @transform_5, window_bounds = array<i64: 1, 128>}, {transform_indices = @transform_6, window_bounds = array<i64: 1>}, {transform_indices = @transform_7, window_bounds = array<i64: 16, 1>}]} {
    %c0 = arith.constant 0 : index
    %c0_0 = arith.constant 0 : index
    %0 = vector.load %arg1[%c0, %c0_0] : memref<16x16xbf16, #tpu.memory_space<vmem>>, vector<16x16xbf16>
    %c0_1 = arith.constant 0 : index
    %c0_2 = arith.constant 0 : index
    %1 = vector.load %arg2[%c0_1, %c0_2] : memref<16x128xbf16, #tpu.memory_space<vmem>>, vector<16x128xbf16>
    %cst = arith.constant dense<0.000000e+00> : vector<16x128xf32>
    %2 = tpu.matmul %0, %1, %cst {dimension_numbers = #tpu.dot_dimension_numbers<[1], [0], [0], [1], [0, 0, 1, 1], [], []>} : vector<16x16xbf16>, vector<16x128xbf16>, vector<16x128xf32> -> vector<16x128xf32>
    %c0_3 = arith.constant 0 : index
    %c0_4 = arith.constant 0 : index
    %3 = vector.load %arg3[%c0_3, %c0_4] : memref<1x128xf32, #tpu.memory_space<vmem>>, vector<1x128xf32>
    %4 = vector.broadcast %3 : vector<1x128xf32> to vector<16x128xf32>
    %5 = arith.addf %2, %4 : vector<16x128xf32>
    %6 = math.tanh %5 : vector<16x128xf32>
    %7 = arith.truncf %6 : vector<16x128xf32> to vector<16x128xbf16>
    %c0_5 = arith.constant 0 : index
    %c0_6 = arith.constant 0 : index
    %8 = vector.load %arg4[%c0_5, %c0_6] : memref<128x128xbf16, #tpu.memory_space<vmem>>, vector<128x128xbf16>
    %cst_7 = arith.constant dense<0.000000e+00> : vector<16x128xf32>
    %9 = tpu.matmul %7, %8, %cst_7 {dimension_numbers = #tpu.dot_dimension_numbers<[1], [0], [0], [1], [0, 0, 1, 1], [], []>} : vector<16x128xbf16>, vector<128x128xbf16>, vector<16x128xf32> -> vector<16x128xf32>
    %c0_8 = arith.constant 0 : index
    %c0_9 = arith.constant 0 : index
    %10 = vector.load %arg5[%c0_8, %c0_9] : memref<1x128xf32, #tpu.memory_space<vmem>>, vector<1x128xf32>
    %11 = vector.broadcast %10 : vector<1x128xf32> to vector<16x128xf32>
    %12 = arith.addf %9, %11 : vector<16x128xf32>
    %13 = math.tanh %12 : vector<16x128xf32>
    %c0_10 = arith.constant 0 : index
    %c0_11 = arith.constant 0 : index
    %14 = vector.load %arg6[%c0_10, %c0_11] : memref<1x128xf32, #tpu.memory_space<vmem>>, vector<1x128xf32>
    %15 = vector.broadcast %14 : vector<1x128xf32> to vector<16x128xf32>
    %16 = arith.mulf %13, %15 : vector<16x128xf32>
    %cst_12 = arith.constant dense<0.000000e+00> : vector<16xf32>
    %17 = vector.multi_reduction <add>, %16, %cst_12 [1] : vector<16x128xf32> to vector<16xf32>
    %18 = vector.shape_cast %17 : vector<16xf32> to vector<16x1xf32>
    %c0_13 = arith.constant 0 : index
    %19 = memref.load %arg7[%c0_13] : memref<1xf32, #tpu.memory_space<smem>>
    %20 = vector.broadcast %19 : f32 to vector<16x1xf32>
    %21 = arith.addf %18, %20 : vector<16x1xf32>
    %c0_14 = arith.constant 0 : index
    %c0_15 = arith.constant 0 : index
    %22 = vector.load %arg8[%c0_14, %c0_15] : memref<16x1xf32, #tpu.memory_space<vmem>>, vector<16x1xf32>
    tpu.vector_store %arg8[%c0_14, %c0_15], %21 {strides = array<i32>} : memref<16x1xf32, #tpu.memory_space<vmem>>, vector<16x1xf32>,
    return
  }
  func.func @transform_0(%arg0: i32) -> (i32, i32) {
    %c0_i32 = arith.constant 0 : i32
    %c0_i32_0 = arith.constant 0 : i32
    return %arg0, %c0_i32 : i32, i32
  }
  func.func @transform_1(%arg0: i32) -> (i32, i32) {
    %c0_i32 = arith.constant 0 : i32
    %c0_i32_0 = arith.constant 0 : i32
    %c0_i32_1 = arith.constant 0 : i32
    return %c0_i32, %c0_i32_0 : i32, i32
  }
  func.func @transform_2(%arg0: i32) -> (i32, i32) {
    %c0_i32 = arith.constant 0 : i32
    %c0_i32_0 = arith.constant 0 : i32
    %c0_i32_1 = arith.constant 0 : i32
    return %c0_i32, %c0_i32_0 : i32, i32
  }
  func.func @transform_3(%arg0: i32) -> (i32, i32) {
    %c0_i32 = arith.constant 0 : i32
    %c0_i32_0 = arith.constant 0 : i32
    %c0_i32_1 = arith.constant 0 : i32
    return %c0_i32, %c0_i32_0 : i32, i32
  }
  func.func @transform_4(%arg0: i32) -> (i32, i32) {
    %c0_i32 = arith.constant 0 : i32
    %c0_i32_0 = arith.constant 0 : i32
    %c0_i32_1 = arith.constant 0 : i32
    return %c0_i32, %c0_i32_0 : i32, i32
  }
  func.func @transform_5(%arg0: i32) -> (i32, i32) {
    %c0_i32 = arith.constant 0 : i32
    %c0_i32_0 = arith.constant 0 : i32
    %c0_i32_1 = arith.constant 0 : i32
    return %c0_i32, %c0_i32_0 : i32, i32
  }
  func.func @transform_6(%arg0: i32) -> i32 {
    %c0_i32 = arith.constant 0 : i32
    %c0_i32_0 = arith.constant 0 : i32
    return %c0_i32 : i32
  }
  func.func @transform_7(%arg0: i32) -> (i32, i32) {
    %c0_i32 = arith.constant 0 : i32
    %c0_i32_0 = arith.constant 0 : i32
    return %arg0, %c0_i32 : i32, i32
  }
}

</mosaic_0001>

<bundles_post_ra>
// kernel: mlp_value_forward.1
= control target key start
LH: loop header
LB: loop body
LE: loop exit
PB: predicated region body
PF: predicated region fallthrough
CT: control target
= control target key end

     0   :  { %vm47_vm0 = vcmask 130048   ;;  %vm166_vm1 = vcmask 7168   ;;  %s323_s1 = inlined_call_operand.vmem [shape: bf16[16,128], index: 1, kind: input, shape index: {}]   ;;  %s324_s0 = inlined_call_operand.vmem [shape: bf16[16,16], index: 0, kind: input, shape index: {}]   ;;  %s325_s3 = inlined_call_operand.vmem [shape: bf16[128,128], index: 3, kind: input, shape index: {}]   ;;  %s326_s2 = inlined_call_operand.vmem [shape: f32[1,128], index: 2, kind: input, shape index: {}]   ;;  %s327_s4 = inlined_call_operand.vmem [shape: f32[1,128], index: 4, kind: input, shape index: {}]   ;;  %s328_s5 = inlined_call_operand.vmem [shape: f32[1,128], index: 5, kind: input, shape index: {}]   ;;  %s329_s6 = inlined_call_operand.<no memory space> [shape: f32[1], index: 6, kind: input, shape index: {}]   ;;  %s330_s7 = inlined_call_operand.vmem [shape: f32[16,1], index: 7, kind: output, shape index: {}]  }
   0x1   :  { %v215_v0 = vld [vmem:[%s323_s1] sm:$0xff]  ;;  %v223_v1 = vld [vmem:[%s325_s3 + $0x38] sm:$0xff]  ;;  %v222_v3 = vld [vmem:[%s325_s3 + $0x30] sm:$0xff]  ;;  %v163_v28 = vstv %s329_s6 }
   0x2   :  { %v214_v2 = vld [vmem:[%s324_s0] sm:$0xff]  ;;  %58 = vmatpush.bf16.msra.mxu0 %v215_v0  ;;  %136 = vmatpush.bf16.msra.mxu1 %v223_v1  ;;  %v221_v4 = vld [vmem:[%s325_s3 + $0x28] sm:$0xff]  ;;  %v219_v6 = vld [vmem:[%s325_s3 + $0x18] sm:$0xff] }
   0x3   :  { %v220_v5 = vld [vmem:[%s325_s3 + $0x20] sm:$0xff]  ;;  %v218_v7 = vld [vmem:[%s325_s3 + $0x10] sm:$0xff]  ;;  %v217_v8 = vld [vmem:[%s325_s3 + $0x8] sm:$0xff] }
   0x4   :  { %v216_v9 = vld [vmem:[%s325_s3] sm:$0xff] }
   0x5   :  { %181 = vmatmul.msk.bf16.vlgmr.msra.gmra.mxu0 %vm47_vm0, %v214_v2  ;;  %v224_v11 = vld [vmem:[%s326_s2] ss:$0 sm:$0xff] }
   0x6   :  { %137 = vmatpush.bf16.msra.mxu1 %v222_v3  ;;  %v225_v18 = vld [vmem:[%s327_s4] ss:$0 sm:$0xff] }
   0x7   :  { %v226_v21 = vld [vmem:[%s328_s5] ss:$0 sm:$0xff] }
   0xa   :  { %138 = vmatpush.bf16.msra.mxu1 %v221_v4 }
   0xe   :  { %139 = vmatpush.bf16.msra.mxu1 %v220_v5 }
  0x12   :  { %140 = vmatpush.bf16.msra.mxu1 %v219_v6 }
  0x16   :  { %141 = vmatpush.bf16.msra.mxu1 %v218_v7 }
  0x1a   :  { %142 = vmatpush.bf16.msra.mxu1 %v217_v8 }
  0x1e   :  { %143 = vmatpush.bf16.msra.mxu1 %v216_v9 }
  0x82   :  { %v60_v10 = vpop.f32.mrf.mxu0 }
  0x83   :  { %v61_v12 = vadd.f32 %v224_v11, %v60_v10 }
  0x85   :  { %227 = vtanh.f32 %v61_v12 }
  0x8a   :  { %v62_v13 = vpop.f32.mrf.mxu0 }
  0x8b   :  { %v63_v14 = vadd.f32 %v224_v11, %v62_v13  ;;  %v228_v15 = vpop.eup %227 }
  0x8d   :  { %229 = vtanh.f32 %v63_v14 }
  0x93   :  { %v230_v16 = vpop.eup %229 }
  0x94   :  { %v67_v17 = vpack.c.bf16 %v230_v16, %v228_v15 }
  0x96   :  { %144 = vmatmul.bf16.vlgmr.msra.gmra.mxu1 %v67_v17 }
 0x113   :  { %v145_v19 = vpop.f32.mrf.mxu1 }
 0x114   :  { %v146_v20 = vadd.f32 %v225_v18, %v145_v19 }
 0x116   :  { %231 = vtanh.f32 %v146_v20 }
 0x11b   :  { %v147_v22 = vpop.f32.mrf.mxu1 }
 0x11c   :  { %v232_v23 = vpop.eup %231  ;;  %v148_v24 = vadd.f32 %v225_v18, %v147_v22 }
 0x11d   :  { %v156_v25 = vmul.f32 %v232_v23, %v226_v21 }
 0x11e   :  { %233 = vtanh.f32 %v148_v24 }
 0x11f   :  { %158 = vadd.xlane.f32.xlu0 %v156_v25 }
 0x124   :  { %v234_v26 = vpop.eup %233 }
 0x125   :  { %v157_v27 = vmul.f32 %v234_v26, %v226_v21 }
 0x127   :  { %160 = vadd.xlane.f32.xlu0 %v157_v27 }
 0x192   :  { %v159_v29 = vpop.xlane.xlu0 %158 }
 0x193   :  { %v164_v30 = vadd.f32 %v163_v28, %v159_v29 }
 0x195   :  { %167 = vst.msk [vmem:[%s330_s7] sm:$0xff] %vm166_vm1, %v164_v30 }
 0x19a   :  { %v161_v31 = vpop.xlane.xlu0 %160 }
 0x19b   :  { %v165_v32 = vadd.f32 %v163_v28, %v161_v31 }
 0x19d   :  { %168 = vst.msk [vmem:[%s330_s7 + $0x8] sm:$0xff] %vm166_vm1, %v165_v32 }

</bundles_post_ra>
